<compile_context>
chip_gen: v7x
topology: tpu7x:2x2x1
jax: 0.10.0
libtpu: 0.0.40
codegen_flags: <defaults>
</compile_context>

<pallas_src>
import functools

import jax
import jax.numpy as jnp
import numpy as np
from jax import lax
from jax.experimental import pallas as pl
from jax.experimental.pallas import tpu as pltpu


def _round_up(x, m):
    return (x + m - 1) // m * m


# ---------------------------------------------------------------------------
# Fused kernel: whole batch in one invocation (batch folded onto lanes).
# ---------------------------------------------------------------------------
def _down1_kernel(x_ref, w1_ref, b1_ref, w2_ref, b2_ref, mask_ref, out_ref,
                  stack_ref, *, wp, lcat):
    # x_ref    : (8, lcat)      channel-padded input, padded plane flattened on lanes,
    #                           batch concatenated along lanes (one lpad slot / image)
    # w1_ref   : (cmid, 72)     conv1 weights, 9 taps stacked along K (8 rows / tap)
    # b1_ref   : (cmid, 1)
    # w2_ref   : (cout, 72)     conv2 weights, 9 taps stacked along K
    # b2_ref   : (cout, 1)
    # mask_ref : (1, lcat)      1.0 on real pixels, 0.0 on pad ring / lane padding
    # out_ref  : (cout, lcat)   2x2 window-max plane (corner gather done in wrapper)
    # stack_ref: (72, lcat)     VMEM scratch holding the tap-stacked activation
    shifts = [dy * wp + dx for dy in (-1, 0, 1) for dx in (-1, 0, 1)]

    def conv3x3(act, w_ref, b_ref):
        # Stack the 9 shifted activation planes along sublanes (8 rows per tap,
        # 8-aligned slots) and run a single K=72 MXU contraction.
        for t, s in enumerate(shifts):
            # pltpu.roll matches jnp.roll: roll by -s brings tap at offset +s.
            tap = act if s == 0 else pltpu.roll(act, (-s) % lcat, axis=1)
            stack_ref[pl.ds(t * 8, 8), :] = tap
        return (jnp.dot(w_ref[...], stack_ref[...],
                        preferred_element_type=jnp.float32) + b_ref[...])

    x = x_ref[...]                       # (8, lcat)
    interior = mask_ref[...]             # (1, lcat)

    # conv1 + ReLU; re-zero pad ring / lane padding so conv2 sees true zero pad.
    h1 = jnp.maximum(conv3x3(x, w1_ref, b1_ref), 0.0) * interior
    # conv2 + ReLU (pad-ring garbage is never consumed by the pool-corner gather).
    h2 = jnp.maximum(conv3x3(h1, w2_ref, b2_ref), 0.0)

    # 2x2 stride-2 max pool: window max via two lane rotations + maxes; the max of
    # window (i, j) lands at padded position (2i+1, 2j+1), gathered in the wrapper.
    wm = jnp.maximum(h2, pltpu.roll(h2, lcat - 1, axis=1))
    wm = jnp.maximum(wm, pltpu.roll(wm, lcat - wp, axis=1))
    out_ref[...] = wm


# ---------------------------------------------------------------------------
# Wrapper: layout glue (NCHW <-> lane-dense padded-flat), weight re-stacking.
# ---------------------------------------------------------------------------
def down1_forward(x_nchw, w1, b1, w2, b2):
    """x_nchw: (N, 3, H, W) f32, H/W even.  Weights in PyTorch convention:
       w1 (8,3,3,3), b1 (8,), w2 (16,8,3,3), b2 (16,). Returns (N,16,H//2,W//2)."""
    N, cin, H, W = x_nchw.shape
    cmid, cout = w1.shape[0], w2.shape[0]
    assert H % 2 == 0 and W % 2 == 0, "MaxPool2d(2) path assumes even H, W"
    assert cin <= 8 and cmid == 8, "kernel assumes 8-row tap slots (Down1 shapes)"
    ho, wo = H // 2, W // 2
    hp, wp = H + 2, W + 2
    lpad = _round_up(hp * wp, 128)       # one 128-aligned slot per image
    lcat = N * lpad
    cpad = 8                             # pad input channels to a full sublane group

    # Input: pad channels 3->8 with zeros, zero-pad spatially by 1, flatten the
    # padded plane onto lanes, pad each image slot to lpad, concat batch on lanes.
    xp = jnp.pad(x_nchw.astype(jnp.float32),
                 ((0, 0), (0, cpad - cin), (1, 1), (1, 1)))           # (N,8,hp,wp)
    xf = jnp.pad(xp.reshape(N, cpad, hp * wp),
                 ((0, 0), (0, 0), (0, lpad - hp * wp)))               # (N,8,lpad)
    xf = jnp.transpose(xf, (1, 0, 2)).reshape(cpad, lcat)             # (8, N*lpad)

    # Weights: pad the input-channel dim to 8 and stack the 9 taps along K so the
    # K index is (kh*3 + kw)*8 + c, matching the tap-slot layout in the kernel.
    def stack_taps(w, c_in_pad):
        wpd = jnp.pad(w.astype(jnp.float32),
                      ((0, 0), (0, c_in_pad - w.shape[1]), (0, 0), (0, 0)))
        return jnp.transpose(wpd, (0, 2, 3, 1)).reshape(w.shape[0], 9 * c_in_pad)

    w1t = stack_taps(w1, cpad)                     # (8, 72)
    w2t = stack_taps(w2, cmid)                     # (16, 72)
    b1c = b1.astype(jnp.float32).reshape(cmid, 1)
    b2c = b2.astype(jnp.float32).reshape(cout, 1)

    # Interior mask (1 = real pixel) per image, tiled over the concatenated lanes.
    q = np.arange(lpad)
    r, c = q // wp, q % wp
    m = ((r >= 1) & (r <= H) & (c >= 1) & (c <= W)).astype(np.float32)
    maskf = jnp.asarray(np.tile(m, N).reshape(1, lcat))

    kernel = functools.partial(_down1_kernel, wp=wp, lcat=lcat)
    wm = pl.pallas_call(
        kernel,
        out_shape=jax.ShapeDtypeStruct((cout, lcat), jnp.float32),
        scratch_shapes=[pltpu.VMEM((9 * 8, lcat), jnp.float32)],
    )(xf, w1t, b1c, w2t, b2c, maskf)

    # Corner gather in the wrapper: the 2x2 window max for output (i, j) sits at
    # padded position (2i+1, 2j+1) of the corresponding image slot.
    wm = wm.reshape(cout, N, lpad).transpose(1, 0, 2)[:, :, :hp * wp]
    wm = wm.reshape(N, cout, hp, wp)
    return wm[:, :, 1:H + 1:2, 1:W + 1:2]


# ---------------------------------------------------------------------------
# Pure-JAX reference matching the PyTorch forward (NCHW).
# ---------------------------------------------------------------------------
def down1_ref(x, w1, b1, w2, b2):
    dn = ("NCHW", "OIHW", "NCHW")
    y = lax.conv_general_dilated(x, w1, (1, 1), ((1, 1), (1, 1)),
                                 dimension_numbers=dn,
                                 precision=lax.Precision.HIGHEST)
    y = jnp.maximum(y + b1[None, :, None, None], 0.0)
    y = lax.conv_general_dilated(y, w2, (1, 1), ((1, 1), (1, 1)),
                                 dimension_numbers=dn,
                                 precision=lax.Precision.HIGHEST)
    y = jnp.maximum(y + b2[None, :, None, None], 0.0)
    return lax.reduce_window(y, -jnp.inf, lax.max, (1, 1, 2, 2), (1, 1, 2, 2),
                             "VALID")


if __name__ == "__main__":
    key = jax.random.PRNGKey(0)
    kx, k1, k2, k3, k4 = jax.random.split(key, 5)

    # Deterministic synthetic parameters (shapes from Down1.__init__)
    x = jax.random.normal(kx, (2, 3, 16, 16), jnp.float32)
    w1 = jax.random.normal(k1, (8, 3, 3, 3), jnp.float32) * 0.2
    b1 = jax.random.normal(k2, (8,), jnp.float32) * 0.1
    w2 = jax.random.normal(k3, (16, 8, 3, 3), jnp.float32) * 0.1
    b2 = jax.random.normal(k4, (16,), jnp.float32) * 0.1

    out = jax.block_until_ready(jax.jit(down1_forward)(x, w1, b1, w2, b2))
    assert out.shape == (2, 16, 8, 8), out.shape

    ref = down1_ref(x, w1, b1, w2, b2)
    err = float(jnp.max(jnp.abs(out - ref)))
    # tolerance leaves headroom for MXU f32 multi-pass rounding in the in-kernel dots
    if not jnp.allclose(out, ref, atol=1e-2, rtol=1e-2):
        raise AssertionError(f"Pallas output mismatch vs reference, max abs err={err}")
    print("KERNEL_OK")
</pallas_src>

<mosaic_0001>
module attributes {stable_mosaic.version = 11 : i64} {
  func.func @_down1_kernel(%arg0: memref<8x768xf32, #tpu.memory_space<vmem>>, %arg1: memref<8x72xf32, #tpu.memory_space<vmem>>, %arg2: memref<8x1xf32, #tpu.memory_space<vmem>>, %arg3: memref<16x72xf32, #tpu.memory_space<vmem>>, %arg4: memref<16x1xf32, #tpu.memory_space<vmem>>, %arg5: memref<1x768xf32, #tpu.memory_space<vmem>>, %arg6: memref<16x768xf32, #tpu.memory_space<vmem>>, %arg7: memref<72x768xf32, #tpu.memory_space<vmem>>) attributes {dimension_semantics = [], scalar_prefetch = 0 : i64, scratch_operands = 1 : i64, tpu.core_type = #tpu.core_type<tc>} {
    %c0 = arith.constant 0 : index
    %c0_0 = arith.constant 0 : index
    %0 = vector.load %arg0[%c0, %c0_0] : memref<8x768xf32, #tpu.memory_space<vmem>>, vector<8x768xf32>
    %c0_1 = arith.constant 0 : index
    %c0_2 = arith.constant 0 : index
    %1 = vector.load %arg5[%c0_1, %c0_2] : memref<1x768xf32, #tpu.memory_space<vmem>>, vector<1x768xf32>
    %c19_i32 = arith.constant 19 : i32
    %2 = tpu.dynamic_rotate %0 by %c19_i32 dim 1 : vector<8x768xf32>, i32 -> vector<8x768xf32>
    %c0_3 = arith.constant 0 : index
    %c0_4 = arith.constant 0 : index
    %3 = vector.load %arg7[%c0_3, %c0_4] : memref<72x768xf32, #tpu.memory_space<vmem>>, vector<8x768xf32>
    tpu.vector_store %arg7[%c0_3, %c0_4], %2 {strides = array<i32>} : memref<72x768xf32, #tpu.memory_space<vmem>>, vector<8x768xf32>,
    %c18_i32 = arith.constant 18 : i32
    %4 = tpu.dynamic_rotate %0 by %c18_i32 dim 1 : vector<8x768xf32>, i32 -> vector<8x768xf32>
    %c8 = arith.constant 8 : index
    %c0_5 = arith.constant 0 : index
    %5 = vector.load %arg7[%c8, %c0_5] : memref<72x768xf32, #tpu.memory_space<vmem>>, vector<8x768xf32>
    tpu.vector_store %arg7[%c8, %c0_5], %4 {strides = array<i32>} : memref<72x768xf32, #tpu.memory_space<vmem>>, vector<8x768xf32>,
    %c17_i32 = arith.constant 17 : i32
    %6 = tpu.dynamic_rotate %0 by %c17_i32 dim 1 : vector<8x768xf32>, i32 -> vector<8x768xf32>
    %c16 = arith.constant 16 : index
    %c0_6 = arith.constant 0 : index
    %7 = vector.load %arg7[%c16, %c0_6] : memref<72x768xf32, #tpu.memory_space<vmem>>, vector<8x768xf32>
    tpu.vector_store %arg7[%c16, %c0_6], %6 {strides = array<i32>} : memref<72x768xf32, #tpu.memory_space<vmem>>, vector<8x768xf32>,
    %c1_i32 = arith.constant 1 : i32
    %8 = tpu.dynamic_rotate %0 by %c1_i32 dim 1 : vector<8x768xf32>, i32 -> vector<8x768xf32>
    %c24 = arith.constant 24 : index
    %c0_7 = arith.constant 0 : index
    %9 = vector.load %arg7[%c24, %c0_7] : memref<72x768xf32, #tpu.memory_space<vmem>>, vector<8x768xf32>
    tpu.vector_store %arg7[%c24, %c0_7], %8 {strides = array<i32>} : memref<72x768xf32, #tpu.memory_space<vmem>>, vector<8x768xf32>,
    %c32 = arith.constant 32 : index
    %c0_8 = arith.constant 0 : index
    %10 = vector.load %arg7[%c32, %c0_8] : memref<72x768xf32, #tpu.memory_space<vmem>>, vector<8x768xf32>
    tpu.vector_store %arg7[%c32, %c0_8], %0 {strides = array<i32>} : memref<72x768xf32, #tpu.memory_space<vmem>>, vector<8x768xf32>,
    %c767_i32 = arith.constant 767 : i32
    %11 = tpu.dynamic_rotate %0 by %c767_i32 dim 1 : vector<8x768xf32>, i32 -> vector<8x768xf32>
    %c40 = arith.constant 40 : index
    %c0_9 = arith.constant 0 : index
    %12 = vector.load %arg7[%c40, %c0_9] : memref<72x768xf32, #tpu.memory_space<vmem>>, vector<8x768xf32>
    tpu.vector_store %arg7[%c40, %c0_9], %11 {strides = array<i32>} : memref<72x768xf32, #tpu.memory_space<vmem>>, vector<8x768xf32>,
    %c751_i32 = arith.constant 751 : i32
    %13 = tpu.dynamic_rotate %0 by %c751_i32 dim 1 : vector<8x768xf32>, i32 -> vector<8x768xf32>
    %c48 = arith.constant 48 : index
    %c0_10 = arith.constant 0 : index
    %14 = vector.load %arg7[%c48, %c0_10] : memref<72x768xf32, #tpu.memory_space<vmem>>, vector<8x768xf32>
    tpu.vector_store %arg7[%c48, %c0_10], %13 {strides = array<i32>} : memref<72x768xf32, #tpu.memory_space<vmem>>, vector<8x768xf32>,
    %c750_i32 = arith.constant 750 : i32
    %15 = tpu.dynamic_rotate %0 by %c750_i32 dim 1 : vector<8x768xf32>, i32 -> vector<8x768xf32>
    %c56 = arith.constant 56 : index
    %c0_11 = arith.constant 0 : index
    %16 = vector.load %arg7[%c56, %c0_11] : memref<72x768xf32, #tpu.memory_space<vmem>>, vector<8x768xf32>
    tpu.vector_store %arg7[%c56, %c0_11], %15 {strides = array<i32>} : memref<72x768xf32, #tpu.memory_space<vmem>>, vector<8x768xf32>,
    %c749_i32 = arith.constant 749 : i32
    %17 = tpu.dynamic_rotate %0 by %c749_i32 dim 1 : vector<8x768xf32>, i32 -> vector<8x768xf32>
    %c64 = arith.constant 64 : index
    %c0_12 = arith.constant 0 : index
    %18 = vector.load %arg7[%c64, %c0_12] : memref<72x768xf32, #tpu.memory_space<vmem>>, vector<8x768xf32>
    tpu.vector_store %arg7[%c64, %c0_12], %17 {strides = array<i32>} : memref<72x768xf32, #tpu.memory_space<vmem>>, vector<8x768xf32>,
    %c0_13 = arith.constant 0 : index
    %c0_14 = arith.constant 0 : index
    %19 = vector.load %arg1[%c0_13, %c0_14] : memref<8x72xf32, #tpu.memory_space<vmem>>, vector<8x72xf32>
    %c0_15 = arith.constant 0 : index
    %c0_16 = arith.constant 0 : index
    %20 = vector.load %arg7[%c0_15, %c0_16] : memref<72x768xf32, #tpu.memory_space<vmem>>, vector<72x768xf32>
    %cst = arith.constant dense<0.000000e+00> : vector<8x768xf32>
    %21 = tpu.matmul %19, %20, %cst {dimension_numbers = #tpu.dot_dimension_numbers<[1], [0], [0], [1], [0, 0, 1, 1], [], []>} : vector<8x72xf32>, vector<72x768xf32>, vector<8x768xf32> -> vector<8x768xf32>
    %c0_17 = arith.constant 0 : index
    %c0_18 = arith.constant 0 : index
    %22 = vector.load %arg2[%c0_17, %c0_18] : memref<8x1xf32, #tpu.memory_space<vmem>>, vector<8x1xf32>
    %23 = vector.broadcast %22 : vector<8x1xf32> to vector<8x768xf32>
    %24 = arith.addf %21, %23 : vector<8x768xf32>
    %cst_19 = arith.constant 0.000000e+00 : f32
    %25 = vector.broadcast %cst_19 : f32 to vector<8x768xf32>
    %26 = arith.maximumf %24, %25 : vector<8x768xf32>
    %27 = vector.broadcast %1 : vector<1x768xf32> to vector<8x768xf32>
    %28 = arith.mulf %26, %27 : vector<8x768xf32>
    %c19_i32_20 = arith.constant 19 : i32
    %29 = tpu.dynamic_rotate %28 by %c19_i32_20 dim 1 : vector<8x768xf32>, i32 -> vector<8x768xf32>
    %c0_21 = arith.constant 0 : index
    %c0_22 = arith.constant 0 : index
    %30 = vector.load %arg7[%c0_21, %c0_22] : memref<72x768xf32, #tpu.memory_space<vmem>>, vector<8x768xf32>
    tpu.vector_store %arg7[%c0_21, %c0_22], %29 {strides = array<i32>} : memref<72x768xf32, #tpu.memory_space<vmem>>, vector<8x768xf32>,
    %c18_i32_23 = arith.constant 18 : i32
    %31 = tpu.dynamic_rotate %28 by %c18_i32_23 dim 1 : vector<8x768xf32>, i32 -> vector<8x768xf32>
    %c8_24 = arith.constant 8 : index
    %c0_25 = arith.constant 0 : index
    %32 = vector.load %arg7[%c8_24, %c0_25] : memref<72x768xf32, #tpu.memory_space<vmem>>, vector<8x768xf32>
    tpu.vector_store %arg7[%c8_24, %c0_25], %31 {strides = array<i32>} : memref<72x768xf32, #tpu.memory_space<vmem>>, vector<8x768xf32>,
    %c17_i32_26 = arith.constant 17 : i32
    %33 = tpu.dynamic_rotate %28 by %c17_i32_26 dim 1 : vector<8x768xf32>, i32 -> vector<8x768xf32>
    %c16_27 = arith.constant 16 : index
    %c0_28 = arith.constant 0 : index
    %34 = vector.load %arg7[%c16_27, %c0_28] : memref<72x768xf32, #tpu.memory_space<vmem>>, vector<8x768xf32>
    tpu.vector_store %arg7[%c16_27, %c0_28], %33 {strides = array<i32>} : memref<72x768xf32, #tpu.memory_space<vmem>>, vector<8x768xf32>,
    %c1_i32_29 = arith.constant 1 : i32
    %35 = tpu.dynamic_rotate %28 by %c1_i32_29 dim 1 : vector<8x768xf32>, i32 -> vector<8x768xf32>
    %c24_30 = arith.constant 24 : index
    %c0_31 = arith.constant 0 : index
    %36 = vector.load %arg7[%c24_30, %c0_31] : memref<72x768xf32, #tpu.memory_space<vmem>>, vector<8x768xf32>
    tpu.vector_store %arg7[%c24_30, %c0_31], %35 {strides = array<i32>} : memref<72x768xf32, #tpu.memory_space<vmem>>, vector<8x768xf32>,
    %c32_32 = arith.constant 32 : index
    %c0_33 = arith.constant 0 : index
    %37 = vector.load %arg7[%c32_32, %c0_33] : memref<72x768xf32, #tpu.memory_space<vmem>>, vector<8x768xf32>
    tpu.vector_store %arg7[%c32_32, %c0_33], %28 {strides = array<i32>} : memref<72x768xf32, #tpu.memory_space<vmem>>, vector<8x768xf32>,
    %c767_i32_34 = arith.constant 767 : i32
    %38 = tpu.dynamic_rotate %28 by %c767_i32_34 dim 1 : vector<8x768xf32>, i32 -> vector<8x768xf32>
    %c40_35 = arith.constant 40 : index
    %c0_36 = arith.constant 0 : index
    %39 = vector.load %arg7[%c40_35, %c0_36] : memref<72x768xf32, #tpu.memory_space<vmem>>, vector<8x768xf32>
    tpu.vector_store %arg7[%c40_35, %c0_36], %38 {strides = array<i32>} : memref<72x768xf32, #tpu.memory_space<vmem>>, vector<8x768xf32>,
    %c751_i32_37 = arith.constant 751 : i32
    %40 = tpu.dynamic_rotate %28 by %c751_i32_37 dim 1 : vector<8x768xf32>, i32 -> vector<8x768xf32>
    %c48_38 = arith.constant 48 : index
    %c0_39 = arith.constant 0 : index
    %41 = vector.load %arg7[%c48_38, %c0_39] : memref<72x768xf32, #tpu.memory_space<vmem>>, vector<8x768xf32>
    tpu.vector_store %arg7[%c48_38, %c0_39], %40 {strides = array<i32>} : memref<72x768xf32, #tpu.memory_space<vmem>>, vector<8x768xf32>,
    %c750_i32_40 = arith.constant 750 : i32
    %42 = tpu.dynamic_rotate %28 by %c750_i32_40 dim 1 : vector<8x768xf32>, i32 -> vector<8x768xf32>
    %c56_41 = arith.constant 56 : index
    %c0_42 = arith.constant 0 : index
    %43 = vector.load %arg7[%c56_41, %c0_42] : memref<72x768xf32, #tpu.memory_space<vmem>>, vector<8x768xf32>
    tpu.vector_store %arg7[%c56_41, %c0_42], %42 {strides = array<i32>} : memref<72x768xf32, #tpu.memory_space<vmem>>, vector<8x768xf32>,
    %c749_i32_43 = arith.constant 749 : i32
    %44 = tpu.dynamic_rotate %28 by %c749_i32_43 dim 1 : vector<8x768xf32>, i32 -> vector<8x768xf32>
    %c64_44 = arith.constant 64 : index
    %c0_45 = arith.constant 0 : index
    %45 = vector.load %arg7[%c64_44, %c0_45] : memref<72x768xf32, #tpu.memory_space<vmem>>, vector<8x768xf32>
    tpu.vector_store %arg7[%c64_44, %c0_45], %44 {strides = array<i32>} : memref<72x768xf32, #tpu.memory_space<vmem>>, vector<8x768xf32>,
    %c0_46 = arith.constant 0 : index
    %c0_47 = arith.constant 0 : index
    %46 = vector.load %arg3[%c0_46, %c0_47] : memref<16x72xf32, #tpu.memory_space<vmem>>, vector<16x72xf32>
    %c0_48 = arith.constant 0 : index
    %c0_49 = arith.constant 0 : index
    %47 = vector.load %arg7[%c0_48, %c0_49] : memref<72x768xf32, #tpu.memory_space<vmem>>, vector<72x768xf32>
    %cst_50 = arith.constant dense<0.000000e+00> : vector<16x768xf32>
    %48 = tpu.matmul %46, %47, %cst_50 {dimension_numbers = #tpu.dot_dimension_numbers<[1], [0], [0], [1], [0, 0, 1, 1], [], []>} : vector<16x72xf32>, vector<72x768xf32>, vector<16x768xf32> -> vector<16x768xf32>
    %c0_51 = arith.constant 0 : index
    %c0_52 = arith.constant 0 : index
    %49 = vector.load %arg4[%c0_51, %c0_52] : memref<16x1xf32, #tpu.memory_space<vmem>>, vector<16x1xf32>
    %50 = vector.broadcast %49 : vector<16x1xf32> to vector<16x768xf32>
    %51 = arith.addf %48, %50 : vector<16x768xf32>
    %cst_53 = arith.constant 0.000000e+00 : f32
    %52 = vector.broadcast %cst_53 : f32 to vector<16x768xf32>
    %53 = arith.maximumf %51, %52 : vector<16x768xf32>
    %c767_i32_54 = arith.constant 767 : i32
    %54 = tpu.dynamic_rotate %53 by %c767_i32_54 dim 1 : vector<16x768xf32>, i32 -> vector<16x768xf32>
    %55 = arith.maximumf %53, %54 : vector<16x768xf32>
    %c750_i32_55 = arith.constant 750 : i32
    %56 = tpu.dynamic_rotate %55 by %c750_i32_55 dim 1 : vector<16x768xf32>, i32 -> vector<16x768xf32>
    %57 = arith.maximumf %55, %56 : vector<16x768xf32>
    %c0_56 = arith.constant 0 : index
    %c0_57 = arith.constant 0 : index
    %58 = vector.load %arg6[%c0_56, %c0_57] : memref<16x768xf32, #tpu.memory_space<vmem>>, vector<16x768xf32>
    tpu.vector_store %arg6[%c0_56, %c0_57], %57 {strides = array<i32>} : memref<16x768xf32, #tpu.memory_space<vmem>>, vector<16x768xf32>,
    return
  }
}

</mosaic_0001>

<bundles_post_ra>
// kernel: down1_forward.1
= control target key start
LH: loop header
LB: loop body
LE: loop exit
PB: predicated region body
PF: predicated region fallthrough
CT: control target
= control target key end

     0   :  { %s1478_s29 = smov 19   ;;  %s1479_s30 = smov 18   ;;  %v1485_v9 = vmov 0.0   ;;  %v1487_v11 = vmov 0   ;;  %v42_v13 = vlaneseq  ;;  %vm299_vm8 = vcmask 588800   ;;  %s2265_s0 = inlined_call_operand.vmem [shape: f32[8,768], index: 0, kind: input, shape index: {}]   ;;  %s2266_s2 = inlined_call_operand.vmem [shape: f32[8,1], index: 2, kind: input, shape index: {}]   ;;  %s2267_s1 = inlined_call_operand.vmem [shape: f32[8,72], index: 1, kind: input, shape index: {}]   ;;  %s2268_s5 = inlined_call_operand.vmem [shape: f32[1,768], index: 5, kind: input, shape index: {}]   ;;  %s2269_s4 = inlined_call_operand.vmem [shape: f32[16,1], index: 4, kind: input, shape index: {}]   ;;  %s2270_s3 = inlined_call_operand.vmem [shape: f32[16,72], index: 3, kind: input, shape index: {}]   ;;  %s2271_s6 = inlined_call_operand.vmem [shape: f32[16,768], index: 6, kind: output, shape index: {}]  }
   0x1   :  { %v1526_v0 = vld [vmem:[%s2265_s0 + $0x20] sm:$0xff]  ;;  %v1531_v1 = vld [vmem:[%s2265_s0 + $0x28] sm:$0xff]  ;;  %s1480_s7 = smov 1   ;;  %s1481_s8 = smov 17   ;;  %v1556_v6 = vld [vmem:[%s2265_s0 + $0x10] sm:$0xff]  ;;  %367 = vmatprep.mubr.f32.mxu0 %v1485_v9  ;;  %438 = vmatprep.mubr.f32.mxu1 %v1485_v9 }
   0x2   :  { %v1536_v2 = vld [vmem:[%s2265_s0] sm:$0xff]  ;;  %v1311_v3 = vpack.i.bf16 %v1526_v0, %v1531_v1  ;;  %v1543_v4 = vld [vmem:[%s2265_s0 + $0x8] sm:$0xff]  ;;  %s1482_s11 = smov 127   ;;  %s1483_s12 = smov 110   ;;  %v1574_v8 = vld [vmem:[%s2265_s0 + $0x18] sm:$0xff]  ;;  %1391 = vset.pattern.permute.xlu0 %v1487_v11  ;;  %1477 = vset.pattern.permute.xlu1 %v1487_v11  ;;  %v1613_v16 = vand.u32 127, %v42_v13 }
   0x3   :  { %v1301_v5 = vpack.i.bf16 %v1543_v4, %v1536_v2  ;;  %v1341_v7 = vpack.i.bf16 %v1556_v6, %v1543_v4  ;;  %s1484_s13 = smov 111   ;;  %s1486_s16 = smov 109   ;;  %v1361_v10 = vpack.i.bf16 %v1556_v6, %v1574_v8  ;;  %v293_v12 = vld [vmem:[%s2266_s2] sm:$0xff] }
   0x4   :  { %1312 = vrot.lane.b32.xlu1 %v1311_v3, %s1478_s29  ;;  %vm44_vm0 = vcmp.lt.s32.totalorder %v1613_v16, 19  ;;  %vm69_vm1 = vcmp.lt.s32.totalorder %v1613_v16, 18  ;;  %vm94_vm2 = vcmp.lt.s32.totalorder %v1613_v16, 17  ;;  %vm119_vm3 = vcmp.lt.s32.totalorder %v1613_v16, 1 }
   0x5   :  { %1302 = vrot.lane.b32.xlu0 %v1301_v5, %s1478_s29  ;;  %vm150_vm4 = vcmp.lt.s32.totalorder %v1613_v16, 127  ;;  %vm200_vm5 = vcmp.lt.s32.totalorder %v1613_v16, 110  ;;  %vm175_vm6 = vcmp.lt.s32.totalorder %v1613_v16, 111  ;;  %vm225_vm7 = vcmp.lt.s32.totalorder %v1613_v16, 109 }
   0x8   :  { %1317 = vrot.lane.b32.xlu1 %v1311_v3, %s1479_s30 }
   0x9   :  { %1307 = vrot.lane.b32.xlu0 %v1301_v5, %s1479_s30 }
   0xc   :  { %1327 = vrot.lane.b32.xlu1 %v1301_v5, %s1480_s7 }
   0xd   :  { %1322 = vrot.lane.b32.xlu0 %v1301_v5, %s1481_s8 }
  0x10   :  { %1337 = vrot.lane.b32.xlu1 %v1311_v3, %s1480_s7 }
  0x11   :  { %1332 = vrot.lane.b32.xlu0 %v1311_v3, %s1481_s8 }
  0x14   :  { %138 = vrot.lane.b32.xlu1 %v1536_v2, %s1482_s11 }
  0x15   :  { %1342 = vrot.lane.b32.xlu0 %v1341_v7, %s1482_s11 }
  0x18   :  { %1352 = vrot.lane.b32.xlu1 %v1341_v7, %s1483_s12 }
  0x19   :  { %1347 = vrot.lane.b32.xlu0 %v1341_v7, %s1484_s13 }
  0x1c   :  { %188 = vrot.lane.b32.xlu1 %v1536_v2, %s1483_s12 }
  0x1d   :  { %163 = vrot.lane.b32.xlu0 %v1536_v2, %s1484_s13 }
  0x20   :  { %217 = vrot.lane.b32.xlu1 %v1556_v6, %s1486_s16 }
  0x21   :  { %215 = vrot.lane.b32.xlu0 %v1543_v4, %s1486_s16 }
  0x24   :  { %1362 = vrot.lane.b32.xlu1 %v1361_v10, %s1479_s30 }
  0x25   :  { %1357 = vrot.lane.b32.xlu0 %v1361_v10, %s1478_s29 }
  0x28   :  { %1367 = vrot.lane.b32.xlu1 %v1361_v10, %s1481_s8 }
  0x29   :  { %213 = vrot.lane.b32.xlu0 %v1536_v2, %s1486_s16 }
  0x2c   :  { %1377 = vrot.lane.b32.xlu1 %v1311_v3, %s1482_s11 }
  0x2d   :  { %1372 = vrot.lane.b32.xlu0 %v1361_v10, %s1480_s7 }
  0x30   :  { %1387 = vrot.lane.b32.xlu1 %v1311_v3, %s1483_s12 }
  0x31   :  { %1382 = vrot.lane.b32.xlu0 %v1311_v3, %s1484_s13 }
  0x34   :  { %223 = vrot.lane.b32.xlu1 %v1531_v1, %s1486_s16 }
  0x35   :  { %144 = vrot.lane.b32.xlu0 %v1574_v8, %s1482_s11 }
  0x38   :  { %169 = vrot.lane.b32.xlu1 %v1574_v8, %s1484_s13 }
  0x39   :  { %221 = vrot.lane.b32.xlu0 %v1526_v0, %s1486_s16 }
  0x3c   :  { %219 = vrot.lane.b32.xlu1 %v1574_v8, %s1486_s16 }
  0x3d   :  { %194 = vrot.lane.b32.xlu0 %v1574_v8, %s1483_s12 }
  0x41   :  { %296 = vperm.xlu0 %1391, %v293_v12  }
  0x76   :  { %v1608_v14 = vpop.permute.xlu1 %1312 }
  0x77   :  { %v1610_v15 = vpop.permute.xlu0 %1302  ;;  %v1314_v17 = vunpack.i.l.bf16 %v1608_v14  ;;  %v1315_v11 = vunpack.i.h.bf16 %v1608_v14 }
  0x78   :  { %v1305_v18 = vunpack.i.h.bf16 %v1610_v15  ;;  %v1304_v19 = vunpack.i.l.bf16 %v1610_v15  ;;  %v1761_v15 = vld [vmem:[%s2267_s1] sm:$0xff] }
  0x7a   :  { %v1618_v20 = vpop.permute.xlu1 %1317  ;;  %v49_v26 = vsel %vm44_vm0, %v1304_v19, %v1305_v18  ;;  %v50_v28 = vsel %vm44_vm0, %v1314_v17, %v1304_v19 }
  0x7b   :  { %v1319_v21 = vunpack.i.l.bf16 %v1618_v20  ;;  %v1621_v22 = vpop.permute.xlu0 %1307  ;;  %v1320_v12 = vunpack.i.h.bf16 %v1618_v20 }
  0x7c   :  { %v1310_v23 = vunpack.i.h.bf16 %v1621_v22  ;;  %v1309_v24 = vunpack.i.l.bf16 %v1621_v22 }
  0x7e   :  { %v1629_v25 = vpop.permute.xlu1 %1327  ;;  %v74_v27 = vsel %vm69_vm1, %v1309_v24, %v1310_v23  ;;  %v75_v29 = vsel %vm69_vm1, %v1319_v21, %v1309_v24 }
  0x7f   :  { %v1330_v30 = vunpack.i.h.bf16 %v1629_v25  ;;  %v1329_v31 = vunpack.i.l.bf16 %v1629_v25  ;;  %v1649_v32 = vpop.permute.xlu0 %1322  ;;  %v1195_v33 = vpack.c.bf16 %v74_v27, %v49_v26  ;;  %v1197_v34 = vpack.c.bf16 %v75_v29, %v50_v28 }
  0x80   :  { %v1325_v35 = vunpack.i.h.bf16 %v1649_v32  ;;  %v1324_v36 = vunpack.i.l.bf16 %v1649_v32 }
  0x81   :  { %1196 = vmatprep.subr.bf16.mxu0 %v1195_v33  ;;  %v124_v37 = vsel %vm119_vm3, %v1329_v31, %v1330_v30  ;;  %v70_v33 = vsel %vm69_vm1, %v1320_v12, %v1319_v21 }
  0x82   :  { %1198 = vmatpush1.bf16.msra.mxu0 %v1197_v34  ;;  %v1657_v38 = vpop.permute.xlu1 %1337  ;;  %v99_v39 = vsel %vm94_vm2, %v1324_v36, %v1325_v35 }
  0x83   :  { %v1339_v40 = vunpack.i.l.bf16 %v1657_v38  ;;  %v1664_v41 = vpop.permute.xlu0 %1332  ;;  %v1199_v42 = vpack.c.bf16 %v124_v37, %v99_v39  ;;  %v1340_v34 = vunpack.i.h.bf16 %v1657_v38 }
  0x84   :  { %v1334_v43 = vunpack.i.l.bf16 %v1664_v41 }
  0x85   :  { %1200 = vmatprep.subr.bf16.mxu0 %v1199_v42  ;;  %v125_v44 = vsel %vm119_vm3, %v1339_v40, %v1329_v31  ;;  %v45_v31 = vsel %vm44_vm0, %v1315_v11, %v1314_v17 }
  0x86   :  { %v1671_v45 = vpop.permute.xlu1 %138  ;;  %v100_v46 = vsel %vm94_vm2, %v1334_v43, %v1324_v36  ;;  %v1335_v36 = vunpack.i.h.bf16 %v1664_v41 }
  0x87   :  { %v1678_v47 = vpop.permute.xlu0 %1342  ;;  %v1201_v48 = vpack.c.bf16 %v125_v44, %v100_v46 }
  0x88   :  { %v1345_v49 = vunpack.i.h.bf16 %v1678_v47  ;;  %v1344_v50 = vunpack.i.l.bf16 %v1678_v47 }
  0x89   :  { %1202 = vmatpush1.bf16.msra.mxu0 %v1201_v48 }
  0x8a   :  { %v1683_v51 = vpop.permute.xlu1 %1352  ;;  %v154_v52 = vsel %vm150_vm4, %v1344_v50, %v1345_v49  ;;  %v155_v53 = vsel %vm150_vm4, %v1671_v45, %v1344_v50 }
  0x8b   :  { %v1355_v54 = vunpack.i.h.bf16 %v1683_v51  ;;  %v1354_v55 = vunpack.i.l.bf16 %v1683_v51  ;;  %v1695_v56 = vpop.permute.xlu0 %1347  ;;  %v1203_v57 = vpack.c.bf16 %v154_v52, %v1543_v4  ;;  %v1205_v58 = vpack.c.bf16 %v155_v53, %v1536_v2 }
  0x8c   :  { %v1350_v59 = vunpack.i.h.bf16 %v1695_v56  ;;  %v1349_v60 = vunpack.i.l.bf16 %v1695_v56  ;;  %v120_v53 = vsel %vm119_vm3, %v1340_v34, %v1339_v40 }
  0x8d   :  { %1204 = vmatprep.subr.bf16.mxu0 %v1203_v57  ;;  %v204_v61 = vsel %vm200_vm5, %v1354_v55, %v1355_v54 }
  0x8e   :  { %1206 = vmatpush1.bf16.msra.mxu0 %v1205_v58  ;;  %v1705_v62 = vpop.permute.xlu1 %188  ;;  %v179_v63 = vsel %vm175_vm6, %v1349_v60, %v1350_v59 }
  0x8f   :  { %v205_v2 = vsel %vm200_vm5, %v1705_v62, %v1354_v55  ;;  %v1714_v3 = vpop.permute.xlu0 %163  ;;  %v1207_v4 = vpack.c.bf16 %v204_v61, %v179_v63 }
  0x90   :  { %v180_v5 = vsel %vm175_vm6, %v1714_v3, %v1349_v60 }
  0x91   :  { %v1209_v7 = vpack.c.bf16 %v205_v2, %v180_v5  ;;  %1208 = vmatprep.subr.bf16.mxu0 %v1207_v4 }
  0x92   :  { %v1720_v10 = vpop.permute.xlu1 %217 }
  0x93   :  { %v216_v19 = vpop.permute.xlu0 %215  ;;  %1210 = vmatpush1.bf16.msra.mxu0 %v1209_v7 }
  0x94   :  { %v229_v24 = vsel %vm225_vm7, %v216_v19, %v1720_v10 }
  0x95   :  { %319 = vmatprep.subr.mxu0 %v229_v24 }
  0x96   :  { %v1363_v26 = vpop.permute.xlu1 %1362 }
  0x97   :  { %v1365_v27 = vunpack.i.h.bf16 %v1363_v26  ;;  %v1364_v28 = vunpack.i.l.bf16 %v1363_v26  ;;  %v1358_v29 = vpop.permute.xlu0 %1357 }
  0x98   :  { %v1360_v37 = vunpack.i.h.bf16 %v1358_v29  ;;  %v1359_v39 = vunpack.i.l.bf16 %v1358_v29 }
  0x99   :  { %v72_v42 = vsel %vm69_vm1, %v1365_v27, %v1364_v28  ;;  %v73_v14 = vsel %vm69_vm1, %v1310_v23, %v1365_v27  ;;  %v71_v44 = vsel %vm69_vm1, %v1364_v28, %v1320_v12  ;;  %v1227_v23 = vpack.c.bf16 %v70_v33, %v45_v31 }
  0x9a   :  { %v1368_v17 = vpop.permute.xlu1 %1367  ;;  %v47_v20 = vsel %vm44_vm0, %v1360_v37, %v1359_v39  ;;  %v48_v21 = vsel %vm44_vm0, %v1305_v18, %v1360_v37  ;;  %v46_v46 = vsel %vm44_vm0, %v1359_v39, %v1315_v11  ;;  %v95_v18 = vsel %vm94_vm2, %v1335_v36, %v1334_v43 }
  0x9b   :  { %v1753_v22 = vpop.permute.xlu0 %213  ;;  %v1211_v48 = vpack.c.bf16 %v72_v42, %v47_v20  ;;  %v1213_v52 = vpack.c.bf16 %v73_v14, %v48_v21  ;;  %v1370_v55 = vunpack.i.h.bf16 %v1368_v17  ;;  %v1369_v57 = vunpack.i.l.bf16 %v1368_v17 }
  0x9c   :  { %v230_v50 = vsel %vm225_vm7, %v1753_v22, %v216_v19  ;;  %v1229_v58 = vpack.c.bf16 %v71_v44, %v46_v46  ;;  %v1231_v41 = vpack.c.bf16 %v120_v53, %v95_v18  ;;  %v29_v53 = vld [vmem:[%s2268_s5] sm:$0x3f] }
  0x9d   :  { %320 = vmatpush1.msra.mxu0 %v230_v50  ;;  %1212 = vmatprep.subr.bf16.mxu1 %v1211_v48  ;;  %v97_v40 = vsel %vm94_vm2, %v1370_v55, %v1369_v57  ;;  %v96_v4 = vsel %vm94_vm2, %v1369_v57, %v1335_v36  ;;  %v98_v5 = vsel %vm94_vm2, %v1325_v35, %v1370_v55 }
  0x9e   :  { %1214 = vmatpush1.bf16.msra.mxu1 %v1213_v52  ;;  %1228 = vmatprep.subr.bf16.mxu0 %v1227_v23  ;;  %v1378_v60 = vpop.permute.xlu1 %1377 }
  0x9f   :  { %v1380_v61 = vunpack.i.h.bf16 %v1378_v60  ;;  %v1379_v63 = vunpack.i.l.bf16 %v1378_v60  ;;  %v1373_v2 = vpop.permute.xlu0 %1372  ;;  %1186 = vmatmul.mubr.msk.f32.vlgmr.msra.gmra.mrb[0].mxu0 %vm299_vm8, %v1761_v15 }
  0xa0   :  { %v1375_v43 = vunpack.i.h.bf16 %v1373_v2  ;;  %v1374_v38 = vunpack.i.l.bf16 %v1373_v2  ;;  %1230 = vmatpush1.bf16.msra.mxu0 %v1229_v58  ;;  %509 = vmatprep.mubr.f32.mxu0 %v1485_v9 }
  0xa1   :  { %1232 = vmatprep.subr.bf16.mxu0 %v1231_v41  ;;  %v156_v7 = vsel %vm150_vm4, %v1379_v63, %v1671_v45  ;;  %v151_v11 = vsel %vm150_vm4, %v1380_v61, %v1379_v63 }
  0xa2   :  { %v121_v12 = vsel %vm119_vm3, %v1374_v38, %v1340_v34  ;;  %v1388_v19 = vpop.permute.xlu1 %1387  ;;  %v122_v24 = vsel %vm119_vm3, %v1375_v43, %v1374_v38  ;;  %v123_v32 = vsel %vm119_vm3, %v1330_v30, %v1375_v43  ;;  %v1235_v36 = vpack.c.bf16 %v156_v7, %v1531_v1 }
  0xa3   :  { %v1233_v35 = vpack.c.bf16 %v121_v12, %v96_v4  ;;  %v1390_v26 = vunpack.i.h.bf16 %v1388_v19  ;;  %v1389_v27 = vunpack.i.l.bf16 %v1388_v19  ;;  %v1383_v28 = vpop.permute.xlu0 %1382  ;;  %v1215_v45 = vpack.c.bf16 %v122_v24, %v97_v40 }
  0xa4   :  { %v1385_v29 = vunpack.i.h.bf16 %v1383_v28  ;;  %v1384_v31 = vunpack.i.l.bf16 %v1383_v28  ;;  %v1217_v33 = vpack.c.bf16 %v123_v32, %v98_v5  ;;  %v1237_v34 = vpack.c.bf16 %v151_v11, %v1526_v0 }
  0xa5   :  { %1216 = vmatprep.subr.bf16.mxu1 %v1215_v45  ;;  %1234 = vmatpush1.bf16.msra.mxu0 %v1233_v35  ;;  %v206_v25 = vsel %vm200_vm5, %v1389_v27, %v1705_v62  ;;  %v201_v1 = vsel %vm200_vm5, %v1390_v26, %v1389_v27 }
  0xa6   :  { %1218 = vmatpush1.bf16.msra.mxu1 %v1217_v33  ;;  %1236 = vmatprep.subr.bf16.mxu0 %v1235_v36  ;;  %v224_v30 = vpop.permute.xlu1 %223  ;;  %v181_v37 = vsel %vm175_vm6, %v1384_v31, %v1714_v3  ;;  %v176_v0 = vsel %vm175_vm6, %v1385_v29, %v1384_v31 }
  0xa7   :  { %v145_v39 = vpop.permute.xlu0 %144  ;;  %v1239_v42 = vpack.c.bf16 %v206_v25, %v181_v37  ;;  %v1241_v20 = vpack.c.bf16 %v201_v1, %v176_v0  ;;  %v231_v46 = vsel %vm225_vm7, %v224_v30, %v1753_v22 }
  0xa8   :  { %v152_v14 = vsel %vm150_vm4, %v145_v39, %v1380_v61  ;;  %v153_v62 = vsel %vm150_vm4, %v1345_v49, %v145_v39 }
  0xa9   :  { %v1219_v17 = vpack.c.bf16 %v152_v14, %v1574_v8  ;;  %v1221_v3 = vpack.c.bf16 %v153_v62, %v1556_v6  ;;  %1238 = vmatpush1.bf16.msra.mxu0 %v1237_v34  ;;  %v814_v62 = vld [vmem:[%s2269_s4 + $0x8] sm:$0xff] }
  0xaa   :  { %1240 = vmatprep.subr.bf16.mxu0 %v1239_v42  ;;  %v170_v21 = vpop.permute.xlu1 %169 }
  0xab   :  { %v222_v44 = vpop.permute.xlu0 %221  ;;  %1220 = vmatprep.subr.bf16.mxu1 %v1219_v17  ;;  %v177_v47 = vsel %vm175_vm6, %v170_v21, %v1385_v29  ;;  %v178_v6 = vsel %vm175_vm6, %v1350_v59, %v170_v21  ;;  %v813_v17 = vld [vmem:[%s2269_s4] sm:$0xff] }
  0xac   :  { %1222 = vmatpush1.bf16.msra.mxu1 %v1221_v3  ;;  %v226_v8 = vsel %vm225_vm7, %v222_v44, %v224_v30 }
  0xad   :  { %1242 = vmatpush1.bf16.msra.mxu0 %v1241_v20 }
  0xae   :  { %461 = vmatprep.subr.mxu0 %v231_v46  ;;  %v220_v23 = vpop.permute.xlu1 %219 }
  0xaf   :  { %v195_v49 = vpop.permute.xlu0 %194  ;;  %v227_v56 = vsel %vm225_vm7, %v220_v23, %v222_v44  ;;  %v228_v51 = vsel %vm225_vm7, %v1720_v10, %v220_v23 }
  0xb0   :  { %v202_v48 = vsel %vm200_vm5, %v195_v49, %v1390_v26  ;;  %v203_v22 = vsel %vm200_vm5, %v1355_v54, %v195_v49  ;;  %v524_v54 = vshrl.u32 %v42_v13, 7 }
  0xb1   :  { %v1223_v50 = vpack.c.bf16 %v202_v48, %v177_v47  ;;  %v1225_v52 = vpack.c.bf16 %v203_v22, %v178_v6  ;;  %462 = vmatpush1.msra.mxu0 %v226_v8 }
  0xb2   :  { %1188 = vmatmul.mubr.msk.f32.vlgmr.msra.gmra.mrb[2].mxu0 %vm299_vm8, %v1761_v15  ;;  %v525_v59 = vsub.s32 0, %v524_v54  ;;  %v529_v55 = vsub.s32 1, %v524_v54  ;;  %v533_v4 = vsub.s32 2, %v524_v54  ;;  %v545_v11 = vsub.s32 5, %v524_v54 }
  0xb3   :  { %1224 = vmatprep.subr.bf16.mxu1 %v1223_v50  ;;  %972 = vmatprep.mubr.f32.mxu0 %v1485_v9  ;;  %v537_v26 = vsub.s32 3, %v524_v54  ;;  %v541_v27 = vsub.s32 4, %v524_v54 }
  0xb4   :  { %1226 = vmatpush1.bf16.msra.mxu1 %v1225_v52  ;;  %v526_v60 = vrot.slane %v29_v53, %v525_v59  ;;  %v530_v63 = vrot.slane %v29_v53, %v529_v55  ;;  %v534_v19 = vrot.slane %v29_v53, %v533_v4  ;;  %v546_v29 = vrot.slane %v29_v53, %v545_v11 }
  0xb5   :  { %390 = vmatprep.subr.mxu1 %v227_v56  ;;  %v538_v36 = vrot.slane %v29_v53, %v537_v26  ;;  %v542_v30 = vrot.slane %v29_v53, %v541_v27 }
  0xb8   :  { %391 = vmatpush1.msra.mxu1 %v228_v51 }
  0xb9   :  { %1187 = vmatmul.mubr.msk.f32.vlgmr.msra.gmra.mrb[0].mxu1 %vm299_vm8, %v1761_v15 }
  0xba   :  { %895 = vmatprep.mubr.f32.mxu1 %v1485_v9 }
  0xc0   :  { %v297_v18 = vpop.permute.xlu0 %296 }
 0x172   :  { %v369_v57 = vpop.f32.mrb[0].mxu0 }
 0x173   :  { %v370_v58 = vadd.f32 %v369_v57, %v297_v18  ;;  %v371_v61 = vpop.f32.mrb[1].mxu0 }
 0x174   :  { %v372_v10 = vadd.f32 %v371_v61, %v297_v18 }
 0x175   :  { %v516_v2 = vmax.f32 %v370_v58, 0.0 }
 0x176   :  { %v517_v41 = vmax.f32 %v372_v10, 0.0 }
 0x177   :  { %v1847_v15 = vmul.f32 %v526_v60, %v516_v2 }
 0x178   :  { %v1849_v43 = vmul.f32 %v530_v63, %v517_v41 }
 0x179   :  { %661 = vrot.lane.b32.xlu1 %v1847_v15, %s1482_s11  ;;  %685 = vrot.lane.b32.xlu0 %v1847_v15, %s1484_s13 }
 0x17a   :  { %v1402_v13 = vpack.i.bf16 %v1849_v43, %v1847_v15 }
 0x17d   :  { %709 = vrot.lane.b32.xlu1 %v1847_v15, %s1483_s12  ;;  %1403 = vrot.lane.b32.xlu0 %v1402_v13, %s1481_s8 }
 0x181   :  { %1393 = vrot.lane.b32.xlu1 %v1402_v13, %s1478_s29 }
 0x185   :  { %v511_v38 = vpop.f32.mrb[2].mxu0  ;;  %1398 = vrot.lane.b32.xlu1 %v1402_v13, %s1479_s30 }
 0x186   :  { %v513_v40 = vpop.f32.mrb[3].mxu0  ;;  %v512_v28 = vadd.f32 %v511_v38, %v297_v18 }
 0x187   :  { %v514_v7 = vadd.f32 %v513_v40, %v297_v18 }
 0x188   :  { %v520_v25 = vmax.f32 %v512_v28, 0.0 }
 0x189   :  { %1408 = vrot.lane.b32.xlu1 %v1402_v13, %s1480_s7  ;;  %v521_v45 = vmax.f32 %v514_v7, 0.0 }
 0x18a   :  { %v1875_v1 = vmul.f32 %v542_v30, %v520_v25 }
 0x18b   :  { %v1867_v37 = vmul.f32 %v546_v29, %v521_v45 }
 0x18c   :  { %v440_v5 = vpop.f32.mrb[0].mxu1 }
 0x18d   :  { %v441_v12 = vadd.f32 %v440_v5, %v297_v18  ;;  %v442_v24 = vpop.f32.mrb[1].mxu1 }
 0x18e   :  { %v443_v35 = vadd.f32 %v442_v24, %v297_v18 }
 0x18f   :  { %v518_v32 = vmax.f32 %v441_v12, 0.0 }
 0x190   :  { %v519_v33 = vmax.f32 %v443_v35, 0.0 }
 0x191   :  { %v1863_v31 = vmul.f32 %v534_v19, %v518_v32 }
 0x192   :  { %v1871_v39 = vmul.f32 %v538_v36, %v519_v33 }
 0x193   :  { %v1412_v34 = vpack.i.bf16 %v1863_v31, %v1849_v43  ;;  %v1437_v42 = vpack.i.bf16 %v1863_v31, %v1867_v37 }
 0x194   :  { %v1427_v0 = vpack.i.bf16 %v1875_v1, %v1871_v39  ;;  %v1457_v14 = vpack.i.bf16 %v1871_v39, %v1863_v31 }
 0x195   :  { %1413 = vrot.lane.b32.xlu0 %v1412_v34, %s1482_s11  ;;  %1423 = vrot.lane.b32.xlu1 %v1412_v34, %s1483_s12 }
 0x199   :  { %1418 = vrot.lane.b32.xlu0 %v1412_v34, %s1484_s13  ;;  %1438 = vrot.lane.b32.xlu1 %v1437_v42, %s1479_s30 }
 0x19d   :  { %1428 = vrot.lane.b32.xlu0 %v1427_v0, %s1478_s29  ;;  %641 = vrot.lane.b32.xlu1 %v1867_v37, %s1480_s7 }
 0x1a1   :  { %1433 = vrot.lane.b32.xlu0 %v1437_v42, %s1478_s29  ;;  %1448 = vrot.lane.b32.xlu1 %v1427_v0, %s1479_s30 }
 0x1a5   :  { %1443 = vrot.lane.b32.xlu0 %v1437_v42, %s1481_s8  ;;  %737 = vrot.lane.b32.xlu1 %v1863_v31, %s1486_s16 }
 0x1a9   :  { %735 = vrot.lane.b32.xlu0 %v1849_v43, %s1486_s16  ;;  %1453 = vrot.lane.b32.xlu1 %v1427_v0, %s1481_s8 }
 0x1ad   :  { %733 = vrot.lane.b32.xlu0 %v1847_v15, %s1486_s16  ;;  %639 = vrot.lane.b32.xlu1 %v1875_v1, %s1480_s7 }
 0x1b1   :  { %1458 = vrot.lane.b32.xlu0 %v1457_v14, %s1480_s7  ;;  %671 = vrot.lane.b32.xlu1 %v1867_v37, %s1482_s11 }
 0x1b5   :  { %1463 = vrot.lane.b32.xlu0 %v1427_v0, %s1482_s11  ;;  %695 = vrot.lane.b32.xlu1 %v1867_v37, %s1484_s13 }
 0x1b9   :  { %1468 = vrot.lane.b32.xlu0 %v1427_v0, %s1484_s13  ;;  %719 = vrot.lane.b32.xlu1 %v1867_v37, %s1483_s12 }
 0x1bd   :  { %1473 = vrot.lane.b32.xlu0 %v1427_v0, %s1483_s12  ;;  %741 = vrot.lane.b32.xlu1 %v1875_v1, %s1486_s16 }
 0x1c1   :  { %739 = vrot.lane.b32.xlu0 %v1871_v39, %s1486_s16  ;;  %817 = vperm.xlu1 %1477, %v813_v17  }
 0x1c5   :  { %743 = vrot.lane.b32.xlu0 %v1867_v37, %s1486_s16 }
 0x1c9   :  { %822 = vperm.xlu0 %1391, %v814_v62  }
 0x1eb   :  { %v1920_v3 = vpop.permute.xlu1 %661  ;;  %v1928_v23 = vpop.permute.xlu0 %685 }
 0x1ef   :  { %v1922_v20 = vpop.permute.xlu1 %709  ;;  %v1930_v50 = vpop.permute.xlu0 %1403 }
 0x1f0   :  { %v1406_v18 = vunpack.i.h.bf16 %v1930_v50  ;;  %v1405_v53 = vunpack.i.l.bf16 %v1930_v50 }
 0x1f2   :  { %v623_v41 = vsel %vm94_vm2, %v1405_v53, %v1406_v18 }
 0x1f3   :  { %v1394_v21 = vpop.permute.xlu1 %1393 }
 0x1f4   :  { %v1396_v44 = vunpack.i.h.bf16 %v1394_v21  ;;  %v1395_v46 = vunpack.i.l.bf16 %v1394_v21 }
 0x1f6   :  { %v575_v8 = vsel %vm44_vm0, %v1395_v46, %v1396_v44 }
 0x1f7   :  { %v1399_v47 = vpop.permute.xlu1 %1398 }
 0x1f8   :  { %v1401_v49 = vunpack.i.h.bf16 %v1399_v47  ;;  %v1400_v6 = vunpack.i.l.bf16 %v1399_v47 }
 0x1fa   :  { %v599_v48 = vsel %vm69_vm1, %v1400_v6, %v1401_v49 }
 0x1fb   :  { %v1243_v22 = vpack.c.bf16 %v599_v48, %v575_v8  ;;  %v1932_v52 = vpop.permute.xlu1 %1408 }
 0x1fc   :  { %v1411_v58 = vunpack.i.h.bf16 %v1932_v52  ;;  %v1410_v60 = vunpack.i.l.bf16 %v1932_v52  ;;  %v2063_v52 = vld [vmem:[%s2270_s3] sm:$0xff] }
 0x1fd   :  { %1244 = vmatprep.subr.bf16.mxu1 %v1243_v22 }
 0x1fe   :  { %v647_v12 = vsel %vm119_vm3, %v1410_v60, %v1411_v58 }
 0x1ff   :  { %v1247_v34 = vpack.c.bf16 %v647_v12, %v623_v41 }
 0x207   :  { %v1934_v56 = vpop.permute.xlu0 %1413  ;;  %v1936_v51 = vpop.permute.xlu1 %1423 }
 0x208   :  { %v1416_v5 = vunpack.i.h.bf16 %v1934_v56  ;;  %v1415_v7 = vunpack.i.l.bf16 %v1934_v56  ;;  %v1426_v62 = vunpack.i.h.bf16 %v1936_v51  ;;  %v1425_v17 = vunpack.i.l.bf16 %v1936_v51 }
 0x20a   :  { %v676_v42 = vsel %vm150_vm4, %v1415_v7, %v1416_v5  ;;  %v677_v47 = vsel %vm150_vm4, %v1920_v3, %v1415_v7 }
 0x20b   :  { %v1938_v54 = vpop.permute.xlu0 %1418  ;;  %v1940_v59 = vpop.permute.xlu1 %1438  ;;  %v1253_v8 = vpack.c.bf16 %v677_v47, %v1847_v15  ;;  %v725_v15 = vsel %vm200_vm5, %v1922_v20, %v1425_v17 }
 0x20c   :  { %v1441_v61 = vunpack.i.h.bf16 %v1940_v59  ;;  %v1440_v10 = vunpack.i.l.bf16 %v1940_v59  ;;  %v1421_v25 = vunpack.i.h.bf16 %v1938_v54  ;;  %v1420_v30 = vunpack.i.l.bf16 %v1938_v54 }
 0x20e   :  { %v598_v11 = vsel %vm69_vm1, %v1401_v49, %v1441_v61  ;;  %v600_v19 = vsel %vm69_vm1, %v1440_v10, %v1400_v6  ;;  %v1251_v49 = vpack.c.bf16 %v676_v42, %v1849_v43  ;;  %v700_v6 = vsel %vm175_vm6, %v1420_v30, %v1421_v25 }
 0x20f   :  { %v1944_v55 = vpop.permute.xlu0 %1428  ;;  %v1946_v57 = vpop.permute.xlu1 %641  ;;  %v701_v43 = vsel %vm175_vm6, %v1928_v23, %v1420_v30 }
 0x210   :  { %v1430_v13 = vunpack.i.l.bf16 %v1944_v55  ;;  %v648_v0 = vsel %vm119_vm3, %v1946_v57, %v1410_v60  ;;  %v1431_v7 = vunpack.i.h.bf16 %v1944_v55 }
 0x213   :  { %v1952_v63 = vpop.permute.xlu0 %1433  ;;  %v1954_v2 = vpop.permute.xlu1 %1448 }
 0x214   :  { %v1436_v38 = vunpack.i.h.bf16 %v1952_v63  ;;  %v1435_v40 = vunpack.i.l.bf16 %v1952_v63  ;;  %v1450_v4 = vunpack.i.l.bf16 %v1954_v2  ;;  %v1451_v60 = vunpack.i.h.bf16 %v1954_v2 }
 0x216   :  { %v574_v24 = vsel %vm44_vm0, %v1396_v44, %v1436_v38  ;;  %v576_v32 = vsel %vm44_vm0, %v1435_v40, %v1395_v46  ;;  %v573_v35 = vsel %vm44_vm0, %v1436_v38, %v1430_v13  ;;  %v597_v29 = vsel %vm69_vm1, %v1441_v61, %v1450_v4 }
 0x217   :  { %v1245_v26 = vpack.c.bf16 %v600_v19, %v576_v32  ;;  %v1261_v27 = vpack.c.bf16 %v598_v11, %v574_v24  ;;  %v1984_v28 = vpop.permute.xlu0 %1443  ;;  %v1986_v45 = vpop.permute.xlu1 %737  ;;  %v1259_v36 = vpack.c.bf16 %v597_v29, %v573_v35  ;;  %v1257_v38 = vpack.c.bf16 %v725_v15, %v701_v43 }
 0x218   :  { %v1445_v33 = vunpack.i.l.bf16 %v1984_v28  ;;  %v1446_v63 = vunpack.i.h.bf16 %v1984_v28  ;;  %v596_v19 = vsel %vm69_vm1, %v1450_v4, %v1451_v60 }
 0x219   :  { %1246 = vmatpush1.bf16.msra.mxu1 %v1245_v26  ;;  %1260 = vmatprep.subr.bf16.mxu0 %v1259_v36  ;;  %v571_v26 = vsel %vm44_vm0, %v1431_v7, %v1435_v40 }
 0x21a   :  { %v624_v14 = vsel %vm94_vm2, %v1445_v33, %v1405_v53  ;;  %1248 = vmatprep.subr.bf16.mxu1 %v1247_v34  ;;  %1262 = vmatpush1.bf16.msra.mxu0 %v1261_v27  ;;  %v724_v53 = vsel %vm200_vm5, %v1425_v17, %v1426_v62  ;;  %v595_v27 = vsel %vm69_vm1, %v1451_v60, %v1440_v10 }
 0x21b   :  { %v1249_v21 = vpack.c.bf16 %v648_v0, %v624_v14  ;;  %v736_v44 = vpop.permute.xlu0 %735  ;;  %v2006_v46 = vpop.permute.xlu1 %1453  ;;  %v1255_v61 = vpack.c.bf16 %v724_v53, %v700_v6  ;;  %v622_v4 = vsel %vm94_vm2, %v1406_v18, %v1446_v63  ;;  %v1275_v17 = vpack.c.bf16 %v595_v27, %v571_v26 }
 0x21c   :  { %v1455_v41 = vunpack.i.l.bf16 %v2006_v46  ;;  %v1456_v32 = vunpack.i.h.bf16 %v2006_v46  ;;  %v748_v35 = vsel %vm225_vm7, %v736_v44, %v1986_v45 }
 0x21d   :  { %1250 = vmatpush1.bf16.msra.mxu1 %v1249_v21 }
 0x21e   :  { %1252 = vmatprep.subr.bf16.mxu1 %v1251_v49  ;;  %v621_v36 = vsel %vm94_vm2, %v1446_v63, %v1455_v41  ;;  %v619_v14 = vsel %vm94_vm2, %v1456_v32, %v1445_v33  ;;  %v620_v47 = vsel %vm94_vm2, %v1455_v41, %v1456_v32 }
 0x21f   :  { %v2017_v48 = vpop.permute.xlu0 %733  ;;  %v640_v22 = vpop.permute.xlu1 %639 }
 0x220   :  { %v643_v10 = vsel %vm119_vm3, %v640_v22, %v1946_v57  ;;  %v749_v30 = vsel %vm225_vm7, %v2017_v48, %v736_v44 }
 0x221   :  { %1254 = vmatpush1.bf16.msra.mxu1 %v1253_v8  ;;  %v1279_v21 = vpack.c.bf16 %v643_v10, %v619_v14 }
 0x222   :  { %1256 = vmatprep.subr.bf16.mxu1 %v1255_v61 }
 0x223   :  { %v1459_v11 = vpop.permute.xlu0 %1458  ;;  %v672_v12 = vpop.permute.xlu1 %671 }
 0x224   :  { %v1461_v2 = vunpack.i.h.bf16 %v1459_v11  ;;  %v1460_v24 = vunpack.i.l.bf16 %v1459_v11  ;;  %v678_v46 = vsel %vm150_vm4, %v672_v12, %v1920_v3 }
 0x225   :  { %1258 = vmatpush1.bf16.msra.mxu1 %v1257_v38 }
 0x226   :  { %v646_v29 = vsel %vm119_vm3, %v1411_v58, %v1460_v24  ;;  %847 = vmatprep.subr.mxu1 %v748_v35  ;;  %v645_v59 = vsel %vm119_vm3, %v1460_v24, %v1461_v2  ;;  %v572_v58 = vsel %vm44_vm0, %v1430_v13, %v1431_v7  ;;  %v644_v28 = vsel %vm119_vm3, %v1461_v2, %v640_v22 }
 0x227   :  { %v1265_v50 = vpack.c.bf16 %v646_v29, %v622_v4  ;;  %v1464_v40 = vpop.permute.xlu0 %1463  ;;  %v696_v34 = vpop.permute.xlu1 %695  ;;  %v1263_v18 = vpack.c.bf16 %v645_v59, %v621_v36  ;;  %v1277_v0 = vpack.c.bf16 %v596_v19, %v572_v58  ;;  %v1283_v22 = vpack.c.bf16 %v678_v46, %v1867_v37 }
 0x228   :  { %v1466_v42 = vunpack.i.h.bf16 %v1464_v40  ;;  %v1465_v57 = vunpack.i.l.bf16 %v1464_v40  ;;  %v702_v15 = vsel %vm175_vm6, %v696_v34, %v1928_v23 }
 0x229   :  { %848 = vmatpush1.msra.mxu1 %v749_v30  ;;  %1264 = vmatprep.subr.bf16.mxu0 %v1263_v18 }
 0x22a   :  { %v675_v55 = vsel %vm150_vm4, %v1416_v5, %v1465_v57  ;;  %1189 = vmatmul.mubr.msk.f32.vlgmr.msra.gmra.mrb[2].mxu1 %vm299_vm8, %v2063_v52  ;;  %1266 = vmatpush1.bf16.msra.mxu0 %v1265_v50  ;;  %v674_v13 = vsel %vm150_vm4, %v1465_v57, %v1466_v42  ;;  %v758_v5 = vld [vmem:[%s2270_s3 + $0x8] sm:$0xff]  ;;  %v673_v6 = vsel %vm150_vm4, %v1466_v42, %v672_v12 }
 0x22b   :  { %v1269_v33 = vpack.c.bf16 %v675_v55, %v1863_v31  ;;  %1276 = vmatprep.subr.bf16.mxu1 %v1275_v17  ;;  %v1469_v44 = vpop.permute.xlu0 %1468  ;;  %901 = vmatprep.mubr.f32.mxu1 %v1485_v9  ;;  %v1267_v56 = vpack.c.bf16 %v674_v13, %v1871_v39  ;;  %v720_v49 = vpop.permute.xlu1 %719  ;;  %v1281_v31 = vpack.c.bf16 %v644_v28, %v620_v47 }
 0x22c   :  { %1278 = vmatpush1.bf16.msra.mxu1 %v1277_v0  ;;  %v1471_v39 = vunpack.i.h.bf16 %v1469_v44  ;;  %v1470_v8 = vunpack.i.l.bf16 %v1469_v44  ;;  %v726_v3 = vsel %vm200_vm5, %v720_v49, %v1922_v20  ;;  %v1285_v61 = vpack.c.bf16 %v673_v6, %v1875_v1 }
 0x22d   :  { %1280 = vmatprep.subr.bf16.mxu1 %v1279_v21  ;;  %1268 = vmatprep.subr.bf16.mxu0 %v1267_v56  ;;  %v1287_v41 = vpack.c.bf16 %v726_v3, %v702_v15 }
 0x22e   :  { %1190 = vmatmul.mubr.msk.f32.gmra.mrb[4].mxu1 %vm299_vm8, %v758_v5  ;;  %1270 = vmatpush1.bf16.msra.mxu0 %v1269_v33  ;;  %v699_v37 = vsel %vm175_vm6, %v1421_v25, %v1470_v8  ;;  %v698_v63 = vsel %vm175_vm6, %v1470_v8, %v1471_v39  ;;  %v697_v51 = vsel %vm175_vm6, %v1471_v39, %v696_v34 }
 0x22f   :  { %v1474_v53 = vpop.permute.xlu0 %1473  ;;  %1049 = vmatprep.mubr.f32.mxu1 %v1485_v9  ;;  %v742_v25 = vpop.permute.xlu1 %741 }
 0x230   :  { %v1476_v43 = vunpack.i.h.bf16 %v1474_v53  ;;  %v1475_v60 = vunpack.i.l.bf16 %v1474_v53  ;;  %1282 = vmatpush1.bf16.msra.mxu1 %v1281_v31 }
 0x231   :  { %1284 = vmatprep.subr.bf16.mxu1 %v1283_v22 }
 0x232   :  { %v723_v20 = vsel %vm200_vm5, %v1426_v62, %v1475_v60  ;;  %v722_v1 = vsel %vm200_vm5, %v1475_v60, %v1476_v43  ;;  %v721_v23 = vsel %vm200_vm5, %v1476_v43, %v720_v49 }
 0x233   :  { %v1273_v38 = vpack.c.bf16 %v723_v20, %v699_v37  ;;  %v740_v54 = vpop.permute.xlu0 %739  ;;  %v1271_v7 = vpack.c.bf16 %v722_v1, %v698_v63  ;;  %v1289_v62 = vpack.c.bf16 %v721_v23, %v697_v51 }
 0x234   :  { %1286 = vmatpush1.bf16.msra.mxu1 %v1285_v61  ;;  %v746_v11 = vsel %vm225_vm7, %v740_v54, %v742_v25  ;;  %v747_v2 = vsel %vm225_vm7, %v1986_v45, %v740_v54 }
 0x235   :  { %1288 = vmatprep.subr.bf16.mxu1 %v1287_v41  ;;  %1272 = vmatprep.subr.bf16.mxu0 %v1271_v7 }
 0x236   :  { %1274 = vmatpush1.bf16.msra.mxu0 %v1273_v38 }
 0x237   :  { %v744_v12 = vpop.permute.xlu0 %743  ;;  %924 = vmatprep.subr.mxu0 %v746_v11 }
 0x238   :  { %1290 = vmatpush1.bf16.msra.mxu1 %v1289_v62  ;;  %v750_v19 = vsel %vm225_vm7, %v744_v12, %v2017_v48  ;;  %v745_v24 = vsel %vm225_vm7, %v742_v25, %v744_v12 }
 0x239   :  { %1001 = vmatprep.subr.mxu1 %v750_v19 }
 0x23a   :  { %925 = vmatpush1.msra.mxu0 %v747_v2 }
 0x23b   :  { %1191 = vmatmul.mubr.msk.f32.vlgmr.msra.gmra.mrb[4].mxu0 %vm299_vm8, %v2063_v52 }
 0x23c   :  { %1002 = vmatpush1.msra.mxu1 %v745_v24  ;;  %978 = vmatprep.mubr.f32.mxu0 %v1485_v9 }
 0x23d   :  { %1193 = vmatmul.mubr.msk.f32.vlgmr.msra.gmra.mrb[6].mxu1 %vm299_vm8, %v2063_v52 }
 0x23e   :  { %1055 = vmatprep.mubr.f32.mxu1 %v1485_v9 }
 0x23f   :  { %1192 = vmatmul.mubr.msk.f32.gmra.mrb[6].mxu0 %vm299_vm8, %v758_v5 }
 0x240   :  { %v818_v26 = vpop.permute.xlu1 %817 }
 0x241   :  { %1194 = vmatmul.mubr.msk.f32.gmra.mrb[8].mxu1 %vm299_vm8, %v758_v5 }
 0x248   :  { %v823_v40 = vpop.permute.xlu0 %822 }
 0x2fd   :  { %v897_v45 = vpop.f32.mrb[2].mxu1 }
 0x2fe   :  { %v899_v48 = vpop.f32.mrb[3].mxu1  ;;  %v898_v0 = vadd.f32 %v897_v45, %v818_v26 }
 0x2ff   :  { %v900_v55 = vadd.f32 %v899_v48, %v818_v26 }
 0x300   :  { %v1062_v21 = vmax.f32 %v898_v0, 0.0 }
 0x301   :  { %v903_v32 = vpop.f32.mrb[4].mxu1  ;;  %v1063_v44 = vmax.f32 %v900_v55, 0.0 }
 0x302   :  { %v905_v35 = vpop.f32.mrb[5].mxu1  ;;  %v904_v14 = vadd.f32 %v903_v32, %v823_v40 }
 0x303   :  { %v906_v28 = vadd.f32 %v905_v35, %v823_v40 }
 0x304   :  { %v1068_v13 = vmax.f32 %v904_v14, 0.0 }
 0x305   :  { %v1069_v56 = vmax.f32 %v906_v28, 0.0 }
 0x30e   :  { %v974_v27 = vpop.f32.mrb[4].mxu0 }
 0x30f   :  { %v975_v4 = vadd.f32 %v974_v27, %v818_v26  ;;  %v976_v29 = vpop.f32.mrb[5].mxu0 }
 0x310   :  { %v1051_v36 = vpop.f32.mrb[6].mxu1  ;;  %v2143_v10 = vadd.f32 %v976_v29, %v818_v26 }
 0x311   :  { %v1064_v59 = vmax.f32 %v975_v4, 0.0  ;;  %v1053_v50 = vpop.f32.mrb[7].mxu1  ;;  %v1052_v33 = vadd.f32 %v1051_v36, %v818_v26 }
 0x312   :  { %v980_v34 = vpop.f32.mrb[6].mxu0  ;;  %v1065_v58 = vmax.f32 %v2143_v10, 0.0  ;;  %v1054_v46 = vadd.f32 %v1053_v50, %v818_v26 }
 0x313   :  { %v981_v9 = vadd.f32 %v980_v34, %v823_v40  ;;  %v982_v18 = vpop.f32.mrb[7].mxu0  ;;  %1082 = vrot.lane.b32.xlu1 %v1064_v59, %s1482_s11  ;;  %v1066_v5 = vmax.f32 %v1052_v33, 0.0 }
 0x314   :  { %v1057_v52 = vpop.f32.mrb[8].mxu1  ;;  %v2147_v42 = vadd.f32 %v982_v18, %v823_v40  ;;  %v1067_v49 = vmax.f32 %v1054_v46, 0.0 }
 0x315   :  { %v1070_v30 = vmax.f32 %v981_v9, 0.0  ;;  %v1059_v57 = vpop.f32.mrb[9].mxu1  ;;  %v1058_v47 = vadd.f32 %v1057_v52, %v823_v40 }
 0x316   :  { %v1071_v17 = vmax.f32 %v2147_v42, 0.0  ;;  %v1060_v6 = vadd.f32 %v1059_v57, %v823_v40 }
 0x317   :  { %1084 = vrot.lane.b32.xlu0 %v1070_v30, %s1482_s11  ;;  %1086 = vrot.lane.b32.xlu1 %v1065_v58, %s1482_s11  ;;  %v1072_v31 = vmax.f32 %v1058_v47, 0.0 }
 0x318   :  { %v1073_v39 = vmax.f32 %v1060_v6, 0.0 }
 0x31b   :  { %1088 = vrot.lane.b32.xlu0 %v1071_v17, %s1482_s11  ;;  %1074 = vrot.lane.b32.xlu1 %v1062_v21, %s1482_s11 }
 0x31f   :  { %1076 = vrot.lane.b32.xlu0 %v1068_v13, %s1482_s11  ;;  %1078 = vrot.lane.b32.xlu1 %v1063_v44, %s1482_s11 }
 0x323   :  { %1080 = vrot.lane.b32.xlu0 %v1069_v56, %s1482_s11  ;;  %1090 = vrot.lane.b32.xlu1 %v1066_v5, %s1482_s11 }
 0x327   :  { %1092 = vrot.lane.b32.xlu0 %v1072_v31, %s1482_s11  ;;  %1094 = vrot.lane.b32.xlu1 %v1067_v49, %s1482_s11 }
 0x32b   :  { %1096 = vrot.lane.b32.xlu0 %v1073_v39, %s1482_s11 }
 0x385   :  { %v1083_v8 = vpop.permute.xlu1 %1082 }
 0x389   :  { %v1085_v22 = vpop.permute.xlu0 %1084  ;;  %v1087_v53 = vpop.permute.xlu1 %1086 }
 0x38a   :  { %v1102_v3 = vsel %vm150_vm4, %v1083_v8, %v1087_v53 }
 0x38b   :  { %v2163_v43 = vmax.f32 %v1064_v59, %v1102_v3 }
 0x38d   :  { %v1089_v60 = vpop.permute.xlu0 %1088  ;;  %1130 = vrot.lane.b32.xlu1 %v2163_v43, %s1483_s12  ;;  %v1075_v61 = vpop.permute.xlu1 %1074 }
 0x38e   :  { %v1103_v15 = vsel %vm150_vm4, %v1085_v22, %v1089_v60 }
 0x38f   :  { %v2169_v37 = vmax.f32 %v1070_v30, %v1103_v15 }
 0x391   :  { %1132 = vrot.lane.b32.xlu0 %v2169_v37, %s1483_s12  ;;  %v1077_v20 = vpop.permute.xlu0 %1076  ;;  %v1079_v63 = vpop.permute.xlu1 %1078 }
 0x392   :  { %v1106_v1 = vsel %vm150_vm4, %v1075_v61, %v1079_v63  ;;  %v1104_v23 = vsel %vm150_vm4, %v1079_v63, %v1083_v8 }
 0x393   :  { %v1110_v41 = vmax.f32 %v1062_v21, %v1106_v1  ;;  %v1111_v51 = vmax.f32 %v1063_v44, %v1104_v23 }
 0x395   :  { %v1081_v38 = vpop.permute.xlu0 %1080  ;;  %1122 = vrot.lane.b32.xlu1 %v1110_v41, %s1483_s12  ;;  %v1091_v54 = vpop.permute.xlu1 %1090 }
 0x396   :  { %v1107_v7 = vsel %vm150_vm4, %v1077_v20, %v1081_v38  ;;  %v1105_v62 = vsel %vm150_vm4, %v1081_v38, %v1085_v22  ;;  %v1100_v11 = vsel %vm150_vm4, %v1087_v53, %v1091_v54 }
 0x397   :  { %v1116_v25 = vmax.f32 %v1068_v13, %v1107_v7  ;;  %v1117_v2 = vmax.f32 %v1069_v56, %v1105_v62  ;;  %v1113_v24 = vmax.f32 %v1065_v58, %v1100_v11 }
 0x399   :  { %1124 = vrot.lane.b32.xlu0 %v1116_v25, %s1483_s12  ;;  %v1093_v12 = vpop.permute.xlu0 %1092  ;;  %1126 = vrot.lane.b32.xlu1 %v1111_v51, %s1483_s12  ;;  %v1095_v19 = vpop.permute.xlu1 %1094 }
 0x39a   :  { %v1101_v45 = vsel %vm150_vm4, %v1089_v60, %v1093_v12  ;;  %v1098_v48 = vsel %vm150_vm4, %v1091_v54, %v1095_v19  ;;  %v1108_v27 = vsel %vm150_vm4, %v1095_v19, %v1075_v61 }
 0x39b   :  { %v1119_v35 = vmax.f32 %v1071_v17, %v1101_v45  ;;  %v1114_v26 = vmax.f32 %v1066_v5, %v1098_v48  ;;  %v1115_v29 = vmax.f32 %v1067_v49, %v1108_v27 }
 0x39d   :  { %1128 = vrot.lane.b32.xlu0 %v1117_v2, %s1483_s12  ;;  %v1097_v32 = vpop.permute.xlu0 %1096  ;;  %1134 = vrot.lane.b32.xlu1 %v1113_v24, %s1483_s12 }
 0x39e   :  { %v1099_v4 = vsel %vm150_vm4, %v1093_v12, %v1097_v32  ;;  %v1109_v59 = vsel %vm150_vm4, %v1097_v32, %v1077_v20 }
 0x39f   :  { %v1120_v36 = vmax.f32 %v1072_v31, %v1099_v4  ;;  %v1121_v10 = vmax.f32 %v1073_v39, %v1109_v59 }
 0x3a1   :  { %1136 = vrot.lane.b32.xlu0 %v1119_v35, %s1483_s12  ;;  %1138 = vrot.lane.b32.xlu1 %v1114_v26, %s1483_s12 }
 0x3a5   :  { %1140 = vrot.lane.b32.xlu0 %v1120_v36, %s1483_s12  ;;  %1142 = vrot.lane.b32.xlu1 %v1115_v29, %s1483_s12 }
 0x3a9   :  { %1144 = vrot.lane.b32.xlu0 %v1121_v10, %s1483_s12 }
 0x3ff   :  { %v1131_v50 = vpop.permute.xlu1 %1130 }
 0x403   :  { %v1133_v40 = vpop.permute.xlu0 %1132 }
 0x407   :  { %v1123_v34 = vpop.permute.xlu1 %1122 }
 0x40b   :  { %v1125_v9 = vpop.permute.xlu0 %1124  ;;  %v1127_v18 = vpop.permute.xlu1 %1126 }
 0x40c   :  { %v1152_v52 = vsel %vm200_vm5, %v1127_v18, %v1131_v50  ;;  %v1154_v58 = vsel %vm200_vm5, %v1123_v34, %v1127_v18 }
 0x40d   :  { %v1158_v30 = vmax.f32 %v1110_v41, %v1154_v58  ;;  %v1159_v42 = vmax.f32 %v1111_v51, %v1152_v52 }
 0x40f   :  { %1170 = vst [vmem:[%s2271_s6] sm:$0xff] %v1158_v30  ;;  %1171 = vst [vmem:[%s2271_s6 + $0x8] sm:$0xff] %v1159_v42  ;;  %v1129_v57 = vpop.permute.xlu0 %1128  ;;  %v1135_v0 = vpop.permute.xlu1 %1134 }
 0x410   :  { %v1153_v14 = vsel %vm200_vm5, %v1129_v57, %v1133_v40  ;;  %v1155_v17 = vsel %vm200_vm5, %v1125_v9, %v1129_v57  ;;  %v1150_v21 = vsel %vm200_vm5, %v1131_v50, %v1135_v0 }
 0x411   :  { %v1164_v55 = vmax.f32 %v1116_v25, %v1155_v17  ;;  %v1165_v13 = vmax.f32 %v1117_v2, %v1153_v14  ;;  %v1160_v28 = vmax.f32 %v2163_v43, %v1150_v21 }
 0x413   :  { %1176 = vst [vmem:[%s2271_s6 + $0x30] sm:$0xff] %v1164_v55  ;;  %1177 = vst [vmem:[%s2271_s6 + $0x38] sm:$0xff] %v1165_v13  ;;  %v1137_v33 = vpop.permute.xlu0 %1136  ;;  %v1139_v44 = vpop.permute.xlu1 %1138 }
 0x414   :  { %1172 = vst [vmem:[%s2271_s6 + $0x10] sm:$0xff] %v1160_v28  ;;  %v1151_v56 = vsel %vm200_vm5, %v1133_v40, %v1137_v33  ;;  %v1148_v5 = vsel %vm200_vm5, %v1135_v0, %v1139_v44 }
 0x415   :  { %v1166_v46 = vmax.f32 %v2169_v37, %v1151_v56  ;;  %v1161_v47 = vmax.f32 %v1113_v24, %v1148_v5 }
 0x417   :  { %1178 = vst [vmem:[%s2271_s6 + $0x40] sm:$0xff] %v1166_v46  ;;  %1173 = vst [vmem:[%s2271_s6 + $0x18] sm:$0xff] %v1161_v47  ;;  %v1141_v49 = vpop.permute.xlu0 %1140  ;;  %v1143_v31 = vpop.permute.xlu1 %1142 }
 0x418   :  { %v1149_v6 = vsel %vm200_vm5, %v1137_v33, %v1141_v49  ;;  %v1146_v39 = vsel %vm200_vm5, %v1139_v44, %v1143_v31  ;;  %v1156_v8 = vsel %vm200_vm5, %v1143_v31, %v1123_v34 }
 0x419   :  { %v1167_v22 = vmax.f32 %v1119_v35, %v1149_v6  ;;  %v1162_v53 = vmax.f32 %v1114_v26, %v1146_v39  ;;  %v1163_v3 = vmax.f32 %v1115_v29, %v1156_v8 }
 0x41b   :  { %1179 = vst [vmem:[%s2271_s6 + $0x48] sm:$0xff] %v1167_v22  ;;  %1174 = vst [vmem:[%s2271_s6 + $0x20] sm:$0xff] %v1162_v53  ;;  %v1145_v43 = vpop.permute.xlu0 %1144 }
 0x41c   :  { %1175 = vst [vmem:[%s2271_s6 + $0x28] sm:$0xff] %v1163_v3  ;;  %v1147_v60 = vsel %vm200_vm5, %v1141_v49, %v1145_v43  ;;  %v1157_v61 = vsel %vm200_vm5, %v1145_v43, %v1125_v9 }
 0x41d   :  { %v1168_v15 = vmax.f32 %v1120_v36, %v1147_v60  ;;  %v1169_v37 = vmax.f32 %v1121_v10, %v1157_v61 }
 0x41f   :  { %1180 = vst [vmem:[%s2271_s6 + $0x50] sm:$0xff] %v1168_v15  ;;  %1181 = vst [vmem:[%s2271_s6 + $0x58] sm:$0xff] %v1169_v37 }

</bundles_post_ra>
